<compile_context>
chip_gen: v5e
topology: v5e:2x2
jax: 0.10.0
libtpu: 0.0.40
codegen_flags: <defaults>
</compile_context>

<pallas_src>
import math

import jax
import jax.numpy as jnp
from jax.experimental import pallas as pl
from jax.experimental.pallas import tpu as pltpu


def ffn_kernel(x_ref, w1_ref, b1_ref, w2_ref, b2_ref, o_ref, acc_ref):
    """One (tm, d_model) token tile x one (tff) chunk of the hidden dim."""
    k = pl.program_id(1)

    @pl.when(k == 0)
    def _():
        acc_ref[...] = jnp.zeros_like(acc_ref)

    # linear_1 chunk: (tm, d_model) @ (d_model, tff) -> f32 accumulator on MXU
    h = jnp.dot(x_ref[...], w1_ref[...], preferred_element_type=jnp.float32)
    # bias + relu on the f32 accumulator (VPU); dropout == identity (eval mode)
    h = jnp.maximum(h + b1_ref[...], 0.0)

    # linear_2 chunk: (tm, tff) @ (tff, d_model), accumulated into f32 scratch.
    # Intentional precision choice: downcast h to the weight dtype (bf16) for
    # the second MXU pass; accumulation stays f32.
    acc_ref[...] += jnp.dot(h.astype(w2_ref.dtype), w2_ref[...],
                            preferred_element_type=jnp.float32)

    @pl.when(k == pl.num_programs(1) - 1)
    def _():
        o_ref[...] = (acc_ref[...] + b2_ref[...]).astype(o_ref.dtype)


def feed_forward(x, w1, b1, w2, b2, *, tm=256, tff=512):
    """x: (B, S, d_model) -> (B, S, d_model).

    w1: (d_model, d_ff), w2: (d_ff, d_model) (already transposed vs. PyTorch's
    (out, in) layout so the kernel does x @ W directly). Biases are kept f32.
    """
    B, S, d_model = x.shape
    d_ff = w1.shape[1]
    M = B * S

    # Tile-size hygiene: tff must divide d_ff; fall back to full d_ff if not.
    tff = min(tff, d_ff)
    if d_ff % tff != 0:
        tff = d_ff
    tm = min(tm, pl.cdiv(M, 8) * 8)          # don't over-tile tiny demos
    tm = max(tm, 8)

    # Pad the token count up to a multiple of tm (keeps the big tile).
    M_pad = pl.cdiv(M, tm) * tm
    x2 = x.reshape(M, d_model)
    if M_pad != M:
        x2 = jnp.pad(x2, ((0, M_pad - M), (0, 0)))

    b1_2 = b1.reshape(1, d_ff).astype(jnp.float32)
    b2_2 = b2.reshape(1, d_model).astype(jnp.float32)

    itemsize = jnp.dtype(x.dtype).itemsize
    cost = pl.CostEstimate(
        flops=4 * M_pad * d_model * d_ff,            # two matmuls
        transcendentals=0,
        bytes_accessed=(2 * M_pad * d_model * itemsize          # x + out
                        + 2 * d_model * d_ff * w1.dtype.itemsize  # W1 + W2
                        + 4 * (d_ff + d_model)),                  # biases (f32)
    )

    out = pl.pallas_call(
        ffn_kernel,
        out_shape=jax.ShapeDtypeStruct((M_pad, d_model), x.dtype),
        grid_spec=pltpu.PrefetchScalarGridSpec(
            num_scalar_prefetch=0,
            grid=(M_pad // tm, d_ff // tff),
            in_specs=[
                pl.BlockSpec((tm, d_model), lambda i, k: (i, 0)),   # x tile
                pl.BlockSpec((d_model, tff), lambda i, k: (0, k)),  # W1 chunk
                pl.BlockSpec((1, tff), lambda i, k: (0, k)),        # b1 chunk
                pl.BlockSpec((tff, d_model), lambda i, k: (k, 0)),  # W2 chunk
                pl.BlockSpec((1, d_model), lambda i, k: (0, 0)),    # b2
            ],
            out_specs=pl.BlockSpec((tm, d_model), lambda i, k: (i, 0)),
            scratch_shapes=[pltpu.VMEM((tm, d_model), jnp.float32)],
        ),
        compiler_params=pltpu.CompilerParams(
            dimension_semantics=("parallel", "arbitrary"),
            vmem_limit_bytes=64 * 1024 * 1024,
        ),
        cost_estimate=cost,
    )(x2, w1, b1_2, w2, b2_2)

    if M_pad != M:
        out = out[:M]
    return out.reshape(B, S, d_model)


def init_linear_params(key, in_features, out_features, dtype=jnp.float32):
    """nn.Linear-style U(-1/sqrt(fan_in), 1/sqrt(fan_in)) init.

    Weight is returned as (in, out) (transposed vs. PyTorch) so the kernel can
    compute x @ W directly.
    """
    kw, kb = jax.random.split(key)
    bound = 1.0 / math.sqrt(in_features)
    w = jax.random.uniform(kw, (in_features, out_features), dtype,
                           minval=-bound, maxval=bound)
    b = jax.random.uniform(kb, (out_features,), dtype,
                           minval=-bound, maxval=bound)
    return w, b


if __name__ == "__main__":
    # Small but lane-dense shapes: (Batch, seq_len, d_model), d_model % 128 == 0.
    B, S, d_model, d_ff = 2, 8, 256, 512
    dropout_p = 0.1  # identity at inference; TODO(synk): training-mode dropout not implemented.

    root = jax.random.PRNGKey(0)
    kx, k1, k2 = jax.random.split(root, 3)

    x_f32 = jax.random.normal(kx, (B, S, d_model), jnp.float32)
    w1_f32, b1 = init_linear_params(k1, d_model, d_ff)
    w2_f32, b2 = init_linear_params(k2, d_ff, d_model)

    # bf16 activations/weights, f32 accumulation + f32 biases.
    x = x_f32.astype(jnp.bfloat16)
    w1 = w1_f32.astype(jnp.bfloat16)
    w2 = w2_f32.astype(jnp.bfloat16)

    # tm=128 keeps padding modest for the tiny demo; tff=256 exercises the
    # d_ff accumulation path (2 k-steps). Real deployments: tm=256, tff=512+.
    y = feed_forward(x, w1, b1, w2, b2, tm=128, tff=256)
    y = jax.block_until_ready(y)

    # Pure-JAX reference with identical dtype semantics.
    h_ref = jnp.maximum(
        jnp.dot(x.reshape(-1, d_model), w1, preferred_element_type=jnp.float32)
        + b1.astype(jnp.float32), 0.0)
    y_ref = (jnp.dot(h_ref.astype(jnp.bfloat16), w2,
                     preferred_element_type=jnp.float32)
             + b2.astype(jnp.float32)).astype(x.dtype).reshape(B, S, d_model)

    assert y.shape == (B, S, d_model)
    assert y.dtype == x.dtype
    assert jnp.allclose(y.astype(jnp.float32), y_ref.astype(jnp.float32),
                        atol=2e-2, rtol=2e-2)
    print("KERNEL_OK")
</pallas_src>

<mosaic_0001>
module attributes {stable_mosaic.version = 11 : i64} {
  func.func @ffn_kernel(%arg0: i32, %arg1: i32, %arg2: memref<16x256xbf16, #tpu.memory_space<vmem>>, %arg3: memref<256x256xbf16, #tpu.memory_space<vmem>>, %arg4: memref<1x256xf32, #tpu.memory_space<vmem>>, %arg5: memref<256x256xbf16, #tpu.memory_space<vmem>>, %arg6: memref<1x256xf32, #tpu.memory_space<vmem>>, %arg7: memref<16x256xbf16, #tpu.memory_space<vmem>>, %arg8: memref<16x256xf32, #tpu.memory_space<vmem>>) attributes {dimension_semantics = [#tpu.dimension_semantics<parallel>, #tpu.dimension_semantics<arbitrary>], iteration_bounds = array<i64: 1, 2>, scalar_prefetch = 0 : i64, scratch_operands = 1 : i64, tpu.core_type = #tpu.core_type<tc>, window_params = [{transform_indices = @transform_0, window_bounds = array<i64: 16, 256>}, {transform_indices = @transform_1, window_bounds = array<i64: 256, 256>}, {transform_indices = @transform_2, window_bounds = array<i64: 1, 256>}, {transform_indices = @transform_3, window_bounds = array<i64: 256, 256>}, {pipeline_mode = #tpu.pipeline_mode<synchronous>, transform_indices = @transform_4, window_bounds = array<i64: 1, 256>}, {transform_indices = @transform_5, window_bounds = array<i64: 16, 256>}]} {
    %c0_i32 = arith.constant 0 : i32
    %0 = arith.cmpi eq, %arg1, %c0_i32 : i32
    %1 = arith.extui %0 : i1 to i32
    %c0_i32_0 = arith.constant 0 : i32
    %2 = arith.cmpi ne, %1, %c0_i32_0 : i32
    scf.if %2 {
      %cst_15 = arith.constant 0.000000e+00 : f32
      %20 = vector.broadcast %cst_15 : f32 to vector<16x256xf32>
      %c0_16 = arith.constant 0 : index
      %c0_17 = arith.constant 0 : index
      %21 = vector.load %arg8[%c0_16, %c0_17] : memref<16x256xf32, #tpu.memory_space<vmem>>, vector<16x256xf32>
      tpu.vector_store %arg8[%c0_16, %c0_17], %20 {strides = array<i32>} : memref<16x256xf32, #tpu.memory_space<vmem>>, vector<16x256xf32>,
    } else {
    }
    %c0 = arith.constant 0 : index
    %c0_1 = arith.constant 0 : index
    %3 = vector.load %arg2[%c0, %c0_1] : memref<16x256xbf16, #tpu.memory_space<vmem>>, vector<16x256xbf16>
    %c0_2 = arith.constant 0 : index
    %c0_3 = arith.constant 0 : index
    %4 = vector.load %arg3[%c0_2, %c0_3] : memref<256x256xbf16, #tpu.memory_space<vmem>>, vector<256x256xbf16>
    %cst = arith.constant dense<0.000000e+00> : vector<16x256xf32>
    %5 = tpu.matmul %3, %4, %cst {dimension_numbers = #tpu.dot_dimension_numbers<[1], [0], [0], [1], [0, 0, 1, 1], [], []>} : vector<16x256xbf16>, vector<256x256xbf16>, vector<16x256xf32> -> vector<16x256xf32>
    %c0_4 = arith.constant 0 : index
    %c0_5 = arith.constant 0 : index
    %6 = vector.load %arg4[%c0_4, %c0_5] : memref<1x256xf32, #tpu.memory_space<vmem>>, vector<1x256xf32>
    %7 = vector.broadcast %6 : vector<1x256xf32> to vector<16x256xf32>
    %8 = arith.addf %5, %7 : vector<16x256xf32>
    %cst_6 = arith.constant 0.000000e+00 : f32
    %9 = vector.broadcast %cst_6 : f32 to vector<16x256xf32>
    %10 = arith.maximumf %8, %9 : vector<16x256xf32>
    %c0_7 = arith.constant 0 : index
    %c0_8 = arith.constant 0 : index
    %11 = vector.load %arg8[%c0_7, %c0_8] : memref<16x256xf32, #tpu.memory_space<vmem>>, vector<16x256xf32>
    %12 = arith.truncf %10 : vector<16x256xf32> to vector<16x256xbf16>
    %c0_9 = arith.constant 0 : index
    %c0_10 = arith.constant 0 : index
    %13 = vector.load %arg5[%c0_9, %c0_10] : memref<256x256xbf16, #tpu.memory_space<vmem>>, vector<256x256xbf16>
    %cst_11 = arith.constant dense<0.000000e+00> : vector<16x256xf32>
    %14 = tpu.matmul %12, %13, %cst_11 {dimension_numbers = #tpu.dot_dimension_numbers<[1], [0], [0], [1], [0, 0, 1, 1], [], []>} : vector<16x256xbf16>, vector<256x256xbf16>, vector<16x256xf32> -> vector<16x256xf32>
    %15 = arith.addf %11, %14 : vector<16x256xf32>
    %c0_12 = arith.constant 0 : index
    %c0_13 = arith.constant 0 : index
    %16 = vector.load %arg8[%c0_12, %c0_13] : memref<16x256xf32, #tpu.memory_space<vmem>>, vector<16x256xf32>
    tpu.vector_store %arg8[%c0_12, %c0_13], %15 {strides = array<i32>} : memref<16x256xf32, #tpu.memory_space<vmem>>, vector<16x256xf32>,
    %c1_i32 = arith.constant 1 : i32
    %17 = arith.cmpi eq, %arg1, %c1_i32 : i32
    %18 = arith.extui %17 : i1 to i32
    %c0_i32_14 = arith.constant 0 : i32
    %19 = arith.cmpi ne, %18, %c0_i32_14 : i32
    scf.if %19 {
      %c0_15 = arith.constant 0 : index
      %c0_16 = arith.constant 0 : index
      %20 = vector.load %arg8[%c0_15, %c0_16] : memref<16x256xf32, #tpu.memory_space<vmem>>, vector<16x256xf32>
      %c0_17 = arith.constant 0 : index
      %c0_18 = arith.constant 0 : index
      %21 = vector.load %arg6[%c0_17, %c0_18] : memref<1x256xf32, #tpu.memory_space<vmem>>, vector<1x256xf32>
      %22 = vector.broadcast %21 : vector<1x256xf32> to vector<16x256xf32>
      %23 = arith.addf %20, %22 : vector<16x256xf32>
      %24 = arith.truncf %23 : vector<16x256xf32> to vector<16x256xbf16>
      %c0_19 = arith.constant 0 : index
      %c0_20 = arith.constant 0 : index
      %25 = vector.load %arg7[%c0_19, %c0_20] : memref<16x256xbf16, #tpu.memory_space<vmem>>, vector<16x256xbf16>
      tpu.vector_store %arg7[%c0_19, %c0_20], %24 {strides = array<i32>} : memref<16x256xbf16, #tpu.memory_space<vmem>>, vector<16x256xbf16>,
    } else {
    }
    return
  }
  func.func @transform_0(%arg0: i32, %arg1: i32) -> (i32, i32) {
    %c0_i32 = arith.constant 0 : i32
    %c0_i32_0 = arith.constant 0 : i32
    return %arg0, %c0_i32 : i32, i32
  }
  func.func @transform_1(%arg0: i32, %arg1: i32) -> (i32, i32) {
    %c0_i32 = arith.constant 0 : i32
    %c0_i32_0 = arith.constant 0 : i32
    return %c0_i32, %arg1 : i32, i32
  }
  func.func @transform_2(%arg0: i32, %arg1: i32) -> (i32, i32) {
    %c0_i32 = arith.constant 0 : i32
    %c0_i32_0 = arith.constant 0 : i32
    return %c0_i32, %arg1 : i32, i32
  }
  func.func @transform_3(%arg0: i32, %arg1: i32) -> (i32, i32) {
    %c0_i32 = arith.constant 0 : i32
    %c0_i32_0 = arith.constant 0 : i32
    return %arg1, %c0_i32 : i32, i32
  }
  func.func @transform_4(%arg0: i32, %arg1: i32) -> (i32, i32) {
    %c0_i32 = arith.constant 0 : i32
    %c0_i32_0 = arith.constant 0 : i32
    %c0_i32_1 = arith.constant 0 : i32
    return %c0_i32, %c0_i32_0 : i32, i32
  }
  func.func @transform_5(%arg0: i32, %arg1: i32) -> (i32, i32) {
    %c0_i32 = arith.constant 0 : i32
    %c0_i32_0 = arith.constant 0 : i32
    return %arg0, %c0_i32 : i32, i32
  }
}

</mosaic_0001>

<bundles_post_ra>
// kernel: tpu_custom_call.1
= control target key start
LH: loop header
LB: loop body
LE: loop exit
PB: predicated region body
PF: predicated region fallthrough
CT: control target
= control target key end

     0   :  { %s2048_s0 = inlined_call_operand.hbm [shape: bf16[16,256], index: 0, kind: input, shape index: {}]   ;;  %s2049_s1 = inlined_call_operand.hbm [shape: bf16[256,512], index: 1, kind: input, shape index: {}]   ;;  %s2050_s2 = inlined_call_operand.hbm [shape: f32[1,512], index: 2, kind: input, shape index: {}]   ;;  %s2051_s3 = inlined_call_operand.hbm [shape: bf16[512,256], index: 3, kind: input, shape index: {}]   ;;  %s2052_s4 = inlined_call_operand.vmem [shape: f32[1,256], index: 4, kind: input, shape index: {}]   ;;  %s2053_s5 = inlined_call_operand.hbm [shape: bf16[16,256], index: 5, kind: output, shape index: {}]  }
   0x1   :  { %2059 = sst [smem:[#allocation19_spill]] %s2048_s0 }
   0x2   :  { %2060 = sst [smem:[#allocation20_spill]] %s2049_s1 }
   0x3   :  { %10 = vsyncpa [#allocation4], 0 }
   0x4   :  { %11 = vsyncpa [#allocation7], 0 }
   0x5   :  { %13 = vsyncpa [#allocation7 + $0x1], 0 }
   0x6   :  { %14 = vsyncpa [#allocation10], 0 }
   0x7   :  { %16 = vsyncpa [#allocation10 + $0x1], 0 }
   0x8   :  { %17 = vsyncpa [#allocation5], 0  ;;  %s1751_s18 = smov 0   ;;  %s1753_s19 = smov 0  }
   0x9   :  { %s1755_s20 = smov 0   ;;  %s1757_s21 = smov 0  }
   0xa   :  { %s1759_s22 = smov 0   ;;  %s1761_s23 = smov 0  }
   0xb LB: > { %2061 = sst [smem:[#allocation16_spill]] %s1699_s20  ;;  %s32_s24 = sadd.s32 1, %s1707_s22  ;;  %s1711_s23 = sphi %s1761_s23, %s23_s23   ;;  %s1707_s22 = sphi %s1759_s22, %s2078_s22   ;;  %s1703_s21 = sphi %s1757_s21, %s2077_s21   ;;  %s1699_s20 = sphi %s1755_s20, %s2073_s20   ;;  %s1695_s19 = sphi %s1753_s19, %s2076_s19   ;;  %s1691_s18 = sphi %s1751_s18, %s2075_s18  }
   0xc   : > { %s68_s25 = sadd.s32 1, %s1699_s20  ;;  %p33_p0 = scmp.ge.s32.totalorder %s32_s24, 2 }
   0xd   : > { %p75_p1 = scmp.ne.s32.totalorder %s1699_s20, %s1695_s19  ;;  %p76_p2 = scmp.eq.s32.totalorder %s1711_s23, 0 }
   0xe   : > { %s2080_s24 = smov (%p33_p0, %s32_s24), 0  ;;  %p1441_p5 = scmp.lt.s32.totalorder %s1711_s23, 2 }
   0xf   : > { %2062 = sst [smem:[#allocation17_spill]] %s2080_s24  ;;  %p1788_p3 = por %p76_p2, %p75_p1 }
  0x10   : > { %s65_s27 = ssub.s32 %s1707_s22, %s2080_s24  ;;  %s225_s28 = sand.u32 1, %s1711_s23  }
  0x11   : > { %p66_p4 = scmp.eq.s32.totalorder %s65_s27, 0  ;;  %s1797_s29 = sand.u32 1, %s1699_s20  }
  0x12   : > { %s2054_s6 = sshll.u32 %s1797_s29, 8  ;;  %s1343_s7 = sshll.u32 %s1707_s22, 3 }
  0x13   : > { %s1800_s30 = scalar_select %p66_p4, %s1699_s20, %s68_s25  }
  0x14   : > { %s2065_s1 = sld [smem:[#allocation20_spill]]  ;;  %s229_s11 = scalar_lea.vmem [#allocation6], %s2054_s6 }
  0x15   : > { %2064 = sst [smem:[#allocation18_spill]] %s1800_s30  ;;  %s237_s12 = sshll.u32 %s229_s11, 4  ;;  %s238_s12 = int_to_ptr.vmem [resolvable:$true] %s237_s12 }
  0x16   : > { %p1811_p6 = pnand %p1441_p5, %p1788_p3  ;;  %s1815_s15 = scalar_lea.sflag [#allocation7], %s225_s28 }
  0x17   : > { %s1713_s16 = smov 256   ;;  %s2055_s17 = smov 128  }
  0x18   : > { %s1715_s25 = smov 8   ;;  %s1823_s27 = sadd.s32 4294967295, %s1711_s23  }
  0x19   : > { %p81_p7 = scmp.ne.s32.totalorder %s1695_s19, %s1691_s18  ;;  %p82_p8 = scmp.eq.s32.totalorder %s1823_s27, 0 }
  0x1a   : > { %s234_s10 = scalar_lea.hbm %s2065_s1, %s1343_s7  ;;  %p1056_p9 = scmp.ge.s32.totalorder %s1711_s23, 1 }
  0x1b   : > { %s235_s13 = sshll.u32 %s234_s10, 4  ;;  %p191_p10 = scmp.lt.s32.totalorder %s1711_s23, 3  ;;  %s236_s13 = int_to_ptr.hbm [resolvable:$true] %s235_s13 }
  0x1c   : > { %1433 = dma.hbm_to_vmem [thread:$0]  (!%p1811_p6), %s236_s13, 4096, %s238_s12, %s1815_s15, %s1713_s16, %s2055_s17, %s1715_s25  }
  0x1d   : > { %p1832_p11 = por %p82_p8, %p81_p7  ;;  %s2068_s0 = sld [smem:[#allocation19_spill]] }
  0x1e   : > { %p1839_p12 = pnand %p1056_p9, %p191_p10  ;;  %s1062_s18 = sshll.u32 %s1797_s29, 1 }
  0x1f   : > { %s1716_s10 = smov [#allocation3]   ;;  %s1063_s12 = sshll.u32 %s1707_s22, 1 }
  0x20   : > { %p1426_p13 = pneg %p1839_p12  ;;  %s208_s11 = sshll.u32 %s1716_s10, 4  ;;  %s209_s11 = int_to_ptr.vmem [resolvable:$true] %s208_s11 }
  0x21   : > { %s255_s28 = scalar_lea.hbm %s2050_s2, %s1063_s12  ;;  %s251_s7 = scalar_lea.vmem [#allocation8], %s1062_s18 }
  0x22   : > { %p1427_p0 = pnand %p1426_p13, %p82_p8  ;;  %s259_s6 = sshll.u32 %s251_s7, 4  ;;  %s260_s6 = int_to_ptr.vmem [resolvable:$true] %s259_s6 }
  0x23   : > { %s206_s8 = sshll.u32 %s2068_s0, 4  ;;  %s257_s17 = sshll.u32 %s255_s28, 4  ;;  %s207_s8 = int_to_ptr.hbm [resolvable:$true] %s206_s8  ;;  %s258_s17 = int_to_ptr.hbm [resolvable:$true] %s257_s17 }
  0x24   : > { %s2070_s0 = smov 128   ;;  %s1345_s10 = sshll.u32 %s1707_s22, 8 }
  0x25   : > { %1429 = dma.hbm_to_vmem [thread:$0]  (!%p1427_p0), %s207_s8, 256, %s209_s11, [#allocation4], %s2070_s0, %s2070_s0, %s1715_s25  }
  0x26   : > { %1436 = dma.hbm_to_vmem [thread:$0]  (!%p1811_p6), %s258_s17, 32, %s260_s6, %s1815_s15  }
  0x27   : > { %s2071_s1 = sshll.u32 %s1797_s29, 8  ;;  %s276_s12 = scalar_lea.hbm %s2051_s3, %s1345_s10 }
  0x28   : > { %s270_s24 = scalar_lea.vmem [#allocation9], %s2071_s1  ;;  %s277_s18 = sshll.u32 %s276_s12, 4  ;;  %s278_s18 = int_to_ptr.hbm [resolvable:$true] %s277_s18 }
  0x29   : > { %s279_s30 = sshll.u32 %s270_s24, 4  ;;  %s267_s16 = scalar_lea.sflag [#allocation10], %s1797_s29  ;;  %s280_s30 = int_to_ptr.vmem [resolvable:$true] %s279_s30 }
  0x2a   : > { %1439 = dma.hbm_to_vmem [thread:$0]  (!%p1811_p6), %s278_s18, 4096, %s280_s30, %s267_s16, %s2070_s0, %s2070_s0, %s1715_s25  }
  0x2b   : > { %291 = sbr.rel (%p1839_p12) target bundleno = 416 (0x1a0), region = 40 }
  0x30   : > { %1674 = dma.done.wait (%p82_p8), [#allocation4], 256  }
  0x31   : > { %1676 = vsyncadd (%p82_p8), [#allocation4], 4294967040  ;;  %s298_s1 = sand.u32 1, %s1823_s27   ;;  %s300_s20 = sand.u32 1, %s1695_s19  }
  0x32   : > { %s1070_s24 = sshll.u32 %s300_s20, 8  ;;  %s299_s29 = scalar_lea.sflag [#allocation7], %s298_s1 }
  0x33   : > { %s1878_s6 = scalar_lea.vmem [#allocation6], %s1070_s24 }
  0x34   : > { %1678 = dma.done.wait (%p1832_p11), %s299_s29, 4128  }
  0x35   : > { %1680 = vsyncadd (%p1832_p11), %s299_s29, 4294963168  ;;  %s1071_s0 = sshll.u32 %s300_s20, 1  ;;  %s319_s14 = scalar_lea.sflag [#allocation10], %s300_s20 }
  0x36   : > { %s1884_s30 = scalar_lea.vmem [#allocation8], %s1071_s0  ;;  %s1886_s15 = scalar_lea.vmem [#allocation9], %s1070_s24 }
  0x37   : > { %1682 = dma.done.wait (%p1832_p11), %s319_s14, 4096  }
  0x38   : > { %1684 = vsyncadd (%p1832_p11), %s319_s14, 4294963200  ;;  %p1073_p1 = scmp.ne.s32.totalorder %s1703_s21, 0 }
  0x3a   : > { %363 = sbr.rel (%p1073_p1) target bundleno = 68 (0x44), region = 60 }
  0x3f   : > { %v1717_v0 = vmov 0.0  }
  0x40   : > { %364 = vst [vmem:[#allocation2 + $0x10] sm:$0xff] %v1717_v0 }
  0x41   : > { %365 = vst [vmem:[#allocation2] sm:$0xff] %v1717_v0 }
  0x42   : > { %366 = vst [vmem:[#allocation2 + $0x18] sm:$0xff] %v1717_v0 }
  0x43   : > { %367 = vst [vmem:[#allocation2 + $0x8] sm:$0xff] %v1717_v0 }
  0x44 PF: > { %v1140_v1 = vld [vmem:[%s1878_s6 + $0x70] sm:$0xf]  ;;  %v1363_v2 = vld [vmem:[%s1878_s6 + $0x74] sm:$0xf0]  ;;  %v1362_v6 = vld [vmem:[%s1878_s6 + $0x74] sm:$0xf] }
  0x45   : > { %v1204_v3 = vld [vmem:[%s1878_s6 + $0xf0] sm:$0xf]  ;;  %v1141_v4 = vor.u32 %v1363_v2, %v1140_v1  ;;  %v1379_v5 = vld [vmem:[%s1878_s6 + $0xf4] sm:$0xf0]  ;;  %v1142_v7 = vld [vmem:[%s1878_s6 + $0x78] sm:$0xf0] }
  0x46   : > { %v1205_v8 = vor.u32 %v1379_v5, %v1204_v3  ;;  %v1145_v9 = vor.u32 %v1362_v6, %v1142_v7  ;;  %v1378_v10 = vld [vmem:[%s1878_s6 + $0xf4] sm:$0xf]  ;;  %v1206_v11 = vld [vmem:[%s1878_s6 + $0xf8] sm:$0xf0]  ;;  %v1132_v12 = vld [vmem:[%s1878_s6 + $0x60] sm:$0xf] }
  0x47   : > { %578 = vmatpush.bf16.msra.mxu0 %v1141_v4  ;;  %v1209_v13 = vor.u32 %v1378_v10, %v1206_v11  ;;  %v1361_v14 = vld [vmem:[%s1878_s6 + $0x64] sm:$0xf0]  ;;  %v1196_v15 = vld [vmem:[%s1878_s6 + $0xe0] sm:$0xf]  ;;  %v1360_v19 = vld [vmem:[%s1878_s6 + $0x64] sm:$0xf] }
  0x48   : > { %v1377_v16 = vld [vmem:[%s1878_s6 + $0xe4] sm:$0xf0]  ;;  %592 = vmatpush.bf16.msra.mxu1 %v1205_v8  ;;  %606 = vmatpush.bf16.msra.mxu2 %v1145_v9  ;;  %v1133_v17 = vor.u32 %v1361_v14, %v1132_v12  ;;  %v1134_v20 = vld [vmem:[%s1878_s6 + $0x68] sm:$0xf0]  ;;  %v1376_v21 = vld [vmem:[%s1878_s6 + $0xe4] sm:$0xf] }
  0x49   : > { %v1197_v18 = vor.u32 %v1377_v16, %v1196_v15  ;;  %620 = vmatpush.bf16.msra.mxu3 %v1209_v13  ;;  %v1137_v22 = vor.u32 %v1360_v19, %v1134_v20  ;;  %v1198_v23 = vld [vmem:[%s1878_s6 + $0xe8] sm:$0xf0]  ;;  %v1124_v24 = vld [vmem:[%s1878_s6 + $0x50] sm:$0xf]  ;;  %v1359_v25 = vld [vmem:[%s1878_s6 + $0x54] sm:$0xf0] }
  0x4a   : > { %v1201_v26 = vor.u32 %v1376_v21, %v1198_v23  ;;  %v1188_v27 = vld [vmem:[%s1878_s6 + $0xd0] sm:$0xf]  ;;  %v1375_v28 = vld [vmem:[%s1878_s6 + $0xd4] sm:$0xf0]  ;;  %v1358_v29 = vld [vmem:[%s1878_s6 + $0x54] sm:$0xf]  ;;  %v1125_v30 = vor.u32 %v1359_v25, %v1124_v24 }
  0x4b   : > { %579 = vmatpush.bf16.msra.mxu0 %v1133_v17  ;;  %v1126_v31 = vld [vmem:[%s1878_s6 + $0x58] sm:$0xf0]  ;;  %v1374_v32 = vld [vmem:[%s1878_s6 + $0xd4] sm:$0xf]  ;;  %v1189_v34 = vor.u32 %v1375_v28, %v1188_v27  ;;  %v1116_v36 = vld [vmem:[%s1878_s6 + $0x40] sm:$0xf] }
  0x4c   : > { %v1190_v33 = vld [vmem:[%s1878_s6 + $0xd8] sm:$0xf0]  ;;  %593 = vmatpush.bf16.msra.mxu1 %v1197_v18  ;;  %607 = vmatpush.bf16.msra.mxu2 %v1137_v22  ;;  %v1129_v35 = vor.u32 %v1358_v29, %v1126_v31  ;;  %v1357_v37 = vld [vmem:[%s1878_s6 + $0x44] sm:$0xf0]  ;;  %v1180_v38 = vld [vmem:[%s1878_s6 + $0xc0] sm:$0xf] }
  0x4d   : > { %621 = vmatpush.bf16.msra.mxu3 %v1201_v26  ;;  %v1193_v39 = vor.u32 %v1374_v32, %v1190_v33  ;;  %v1373_v40 = vld [vmem:[%s1878_s6 + $0xc4] sm:$0xf0]  ;;  %v1356_v41 = vld [vmem:[%s1878_s6 + $0x44] sm:$0xf]  ;;  %v1118_v42 = vld [vmem:[%s1878_s6 + $0x48] sm:$0xf0]  ;;  %v1117_v45 = vor.u32 %v1357_v37, %v1116_v36 }
  0x4e   : > { %v1372_v43 = vld [vmem:[%s1878_s6 + $0xc4] sm:$0xf]  ;;  %v1182_v44 = vld [vmem:[%s1878_s6 + $0xc8] sm:$0xf0]  ;;  %v1181_v46 = vor.u32 %v1373_v40, %v1180_v38  ;;  %v1121_v47 = vor.u32 %v1356_v41, %v1118_v42  ;;  %v1108_v48 = vld [vmem:[%s1878_s6 + $0x30] sm:$0xf] }
  0x4f   : > { %580 = vmatpush.bf16.msra.mxu0 %v1125_v30  ;;  %v1355_v49 = vld [vmem:[%s1878_s6 + $0x34] sm:$0xf0]  ;;  %v1172_v50 = vld [vmem:[%s1878_s6 + $0xb0] sm:$0xf]  ;;  %v1185_v51 = vor.u32 %v1372_v43, %v1182_v44  ;;  %v1354_v53 = vld [vmem:[%s1878_s6 + $0x34] sm:$0xf] }
  0x50   : > { %594 = vmatpush.bf16.msra.mxu1 %v1189_v34  ;;  %608 = vmatpush.bf16.msra.mxu2 %v1129_v35  ;;  %v1371_v52 = vld [vmem:[%s1878_s6 + $0xb4] sm:$0xf0]  ;;  %v1110_v54 = vld [vmem:[%s1878_s6 + $0x38] sm:$0xf0]  ;;  %v1370_v55 = vld [vmem:[%s1878_s6 + $0xb4] sm:$0xf]  ;;  %v1109_v57 = vor.u32 %v1355_v49, %v1108_v48 }
  0x51   : > { %622 = vmatpush.bf16.msra.mxu3 %v1193_v39  ;;  %v1174_v56 = vld [vmem:[%s1878_s6 + $0xb8] sm:$0xf0]  ;;  %v1173_v58 = vor.u32 %v1371_v52, %v1172_v50  ;;  %v1113_v59 = vor.u32 %v1354_v53, %v1110_v54  ;;  %v1100_v60 = vld [vmem:[%s1878_s6 + $0x20] sm:$0xf]  ;;  %v1353_v61 = vld [vmem:[%s1878_s6 + $0x24] sm:$0xf0] }
  0x52   : > { %v1164_v62 = vld [vmem:[%s1878_s6 + $0xa0] sm:$0xf]  ;;  %v1177_v63 = vor.u32 %v1370_v55, %v1174_v56  ;;  %v1369_v0 = vld [vmem:[%s1878_s6 + $0xa4] sm:$0xf0]  ;;  %v1352_v1 = vld [vmem:[%s1878_s6 + $0x24] sm:$0xf]  ;;  %v1101_v5 = vor.u32 %v1353_v61, %v1100_v60 }
  0x53   : > { %581 = vmatpush.bf16.msra.mxu0 %v1117_v45  ;;  %v1102_v2 = vld [vmem:[%s1878_s6 + $0x28] sm:$0xf0]  ;;  %v1368_v3 = vld [vmem:[%s1878_s6 + $0xa4] sm:$0xf]  ;;  %v1165_v6 = vor.u32 %v1369_v0, %v1164_v62  ;;  %v1092_v8 = vld [vmem:[%s1878_s6 + $0x10] sm:$0xf] }
  0x54   : > { %595 = vmatpush.bf16.msra.mxu1 %v1181_v46  ;;  %609 = vmatpush.bf16.msra.mxu2 %v1121_v47  ;;  %v1166_v4 = vld [vmem:[%s1878_s6 + $0xa8] sm:$0xf0]  ;;  %v1105_v7 = vor.u32 %v1352_v1, %v1102_v2  ;;  %v1351_v9 = vld [vmem:[%s1878_s6 + $0x14] sm:$0xf0]  ;;  %v1156_v10 = vld [vmem:[%s1878_s6 + $0x90] sm:$0xf] }
  0x55   : > { %623 = vmatpush.bf16.msra.mxu3 %v1185_v51  ;;  %v1169_v11 = vor.u32 %v1368_v3, %v1166_v4  ;;  %v1367_v12 = vld [vmem:[%s1878_s6 + $0x94] sm:$0xf0]  ;;  %v1350_v13 = vld [vmem:[%s1878_s6 + $0x14] sm:$0xf]  ;;  %v1094_v14 = vld [vmem:[%s1878_s6 + $0x18] sm:$0xf0]  ;;  %v1093_v17 = vor.u32 %v1351_v9, %v1092_v8 }
  0x56   : > { %v1366_v15 = vld [vmem:[%s1878_s6 + $0x94] sm:$0xf]  ;;  %v1158_v16 = vld [vmem:[%s1878_s6 + $0x98] sm:$0xf0]  ;;  %v1084_v18 = vld [vmem:[%s1878_s6] sm:$0xf]  ;;  %v1157_v20 = vor.u32 %v1367_v12, %v1156_v10  ;;  %v1097_v21 = vor.u32 %v1350_v13, %v1094_v14 }
  0x57   : > { %582 = vmatpush.bf16.msra.mxu0 %v1109_v57  ;;  %v1349_v19 = vld [vmem:[%s1878_s6 + $0x4] sm:$0xf0]  ;;  %v1148_v22 = vld [vmem:[%s1878_s6 + $0x80] sm:$0xf]  ;;  %v1348_v24 = vld [vmem:[%s1878_s6 + $0x4] sm:$0xf]  ;;  %v1161_v25 = vor.u32 %v1366_v15, %v1158_v16 }
  0x58   : > { %596 = vmatpush.bf16.msra.mxu1 %v1173_v58  ;;  %610 = vmatpush.bf16.msra.mxu2 %v1113_v59  ;;  %v1365_v23 = vld [vmem:[%s1878_s6 + $0x84] sm:$0xf0]  ;;  %v1086_v26 = vld [vmem:[%s1878_s6 + $0x8] sm:$0xf0]  ;;  %v1364_v27 = vld [vmem:[%s1878_s6 + $0x84] sm:$0xf]  ;;  %v1085_v32 = vor.u32 %v1349_v19, %v1084_v18 }
  0x59   : > { %624 = vmatpush.bf16.msra.mxu3 %v1177_v63  ;;  %v1150_v28 = vld [vmem:[%s1878_s6 + $0x88] sm:$0xf0]  ;;  %v1076_v29 = vld [vmem:[#allocation3] sm:$0xf]  ;;  %v1268_v30 = vld [vmem:[%s1886_s15 + $0x70] sm:$0xf]  ;;  %v1149_v36 = vor.u32 %v1365_v23, %v1148_v22  ;;  %v1089_v37 = vor.u32 %v1348_v24, %v1086_v26 }
  0x5a   : > { %v1395_v31 = vld [vmem:[%s1886_s15 + $0x74] sm:$0xf0]  ;;  %v1347_v33 = vld [vmem:[#allocation3 + $0x4] sm:$0xf0]  ;;  %v1270_v35 = vld [vmem:[%s1886_s15 + $0x78] sm:$0xf0]  ;;  %v1153_v40 = vor.u32 %v1364_v27, %v1150_v28 }
  0x5b   : > { %583 = vmatpush.bf16.msra.mxu0 %v1101_v5  ;;  %v1394_v34 = vld [vmem:[%s1886_s15 + $0x74] sm:$0xf]  ;;  %v1346_v38 = vld [vmem:[#allocation3 + $0x4] sm:$0xf]  ;;  %v1078_v39 = vld [vmem:[#allocation3 + $0x8] sm:$0xf0]  ;;  %v1269_v41 = vor.u32 %v1395_v31, %v1268_v30  ;;  %v1077_v45 = vor.u32 %v1347_v33, %v1076_v29 }
  0x5c   : > { %597 = vmatpush.bf16.msra.mxu1 %v1165_v6  ;;  %611 = vmatpush.bf16.msra.mxu2 %v1105_v7  ;;  %v1260_v42 = vld [vmem:[%s1886_s15 + $0x60] sm:$0xf]  ;;  %v1332_v43 = vld [vmem:[%s1886_s15 + $0xf0] sm:$0xf]  ;;  %v1411_v44 = vld [vmem:[%s1886_s15 + $0xf4] sm:$0xf0]  ;;  %v1273_v46 = vor.u32 %v1394_v34, %v1270_v35  ;;  %v1081_v50 = vor.u32 %v1346_v38, %v1078_v39 }
  0x5d   : > { %625 = vmatpush.bf16.msra.mxu3 %v1169_v11  ;;  %v1393_v47 = vld [vmem:[%s1886_s15 + $0x64] sm:$0xf0]  ;;  %v1410_v48 = vld [vmem:[%s1886_s15 + $0xf4] sm:$0xf]  ;;  %v1334_v49 = vld [vmem:[%s1886_s15 + $0xf8] sm:$0xf0]  ;;  %v1333_v53 = vor.u32 %v1411_v44, %v1332_v43 }
  0x5e   : > { %v1392_v51 = vld [vmem:[%s1886_s15 + $0x64] sm:$0xf]  ;;  %v1262_v52 = vld [vmem:[%s1886_s15 + $0x68] sm:$0xf0]  ;;  %v1261_v54 = vor.u32 %v1393_v47, %v1260_v42  ;;  %v1337_v55 = vor.u32 %v1410_v48, %v1334_v49  ;;  %v1252_v56 = vld [vmem:[%s1886_s15 + $0x50] sm:$0xf] }
  0x5f   : > { %584 = vmatpush.bf16.msra.mxu0 %v1093_v17  ;;  %v1324_v57 = vld [vmem:[%s1886_s15 + $0xe0] sm:$0xf]  ;;  %v1409_v58 = vld [vmem:[%s1886_s15 + $0xe4] sm:$0xf0]  ;;  %v1265_v59 = vor.u32 %v1392_v51, %v1262_v52  ;;  %v1391_v60 = vld [vmem:[%s1886_s15 + $0x54] sm:$0xf0] }
  0x60   : > { %598 = vmatpush.bf16.msra.mxu1 %v1157_v20  ;;  %612 = vmatpush.bf16.msra.mxu2 %v1097_v21  ;;  %v1408_v61 = vld [vmem:[%s1886_s15 + $0xe4] sm:$0xf]  ;;  %v1326_v62 = vld [vmem:[%s1886_s15 + $0xe8] sm:$0xf0]  ;;  %v1390_v63 = vld [vmem:[%s1886_s15 + $0x54] sm:$0xf]  ;;  %v1325_v1 = vor.u32 %v1409_v58, %v1324_v57  ;;  %v1253_v2 = vor.u32 %v1391_v60, %v1252_v56 }
  0x61   : > { %626 = vmatpush.bf16.msra.mxu3 %v1161_v25  ;;  %v1254_v0 = vld [vmem:[%s1886_s15 + $0x58] sm:$0xf0]  ;;  %v1329_v3 = vor.u32 %v1408_v61, %v1326_v62  ;;  %v1244_v5 = vld [vmem:[%s1886_s15 + $0x40] sm:$0xf]  ;;  %v1389_v6 = vld [vmem:[%s1886_s15 + $0x44] sm:$0xf0] }
  0x62   : > { %v1257_v4 = vor.u32 %v1390_v63, %v1254_v0  ;;  %v1388_v7 = vld [vmem:[%s1886_s15 + $0x44] sm:$0xf]  ;;  %v1246_v8 = vld [vmem:[%s1886_s15 + $0x48] sm:$0xf0]  ;;  %v1245_v9 = vor.u32 %v1389_v6, %v1244_v5  ;;  %v1316_v11 = vld [vmem:[%s1886_s15 + $0xd0] sm:$0xf] }
  0x63   : > { %585 = vmatpush.bf16.msra.mxu0 %v1085_v32  ;;  %v1249_v10 = vor.u32 %v1388_v7, %v1246_v8  ;;  %v1407_v12 = vld [vmem:[%s1886_s15 + $0xd4] sm:$0xf0]  ;;  %v1406_v13 = vld [vmem:[%s1886_s15 + $0xd4] sm:$0xf]  ;;  %v1318_v15 = vld [vmem:[%s1886_s15 + $0xd8] sm:$0xf0] }
  0x64   : > { %599 = vmatpush.bf16.msra.mxu1 %v1149_v36  ;;  %613 = vmatpush.bf16.msra.mxu2 %v1089_v37  ;;  %v1317_v14 = vor.u32 %v1407_v12, %v1316_v11  ;;  %v1321_v16 = vor.u32 %v1406_v13, %v1318_v15  ;;  %v1236_v17 = vld [vmem:[%s1886_s15 + $0x30] sm:$0xf]  ;;  %v1387_v18 = vld [vmem:[%s1886_s15 + $0x34] sm:$0xf0]  ;;  %v1386_v19 = vld [vmem:[%s1886_s15 + $0x34] sm:$0xf] }
  0x65   : > { %627 = vmatpush.bf16.msra.mxu3 %v1153_v40  ;;  %v1237_v20 = vor.u32 %v1387_v18, %v1236_v17  ;;  %v1238_v21 = vld [vmem:[%s1886_s15 + $0x38] sm:$0xf0]  ;;  %v1308_v23 = vld [vmem:[%s1886_s15 + $0xc0] sm:$0xf]  ;;  %v1405_v24 = vld [vmem:[%s1886_s15 + $0xc4] sm:$0xf0] }
  0x66   : > { %586 = vmatmul.bf16.vlgmr.msra.gmra.mxu0 %v1077_v45  ;;  %v1241_v22 = vor.u32 %v1386_v19, %v1238_v21  ;;  %v1404_v25 = vld [vmem:[%s1886_s15 + $0xc4] sm:$0xf]  ;;  %v1309_v26 = vor.u32 %v1405_v24, %v1308_v23  ;;  %v1310_v27 = vld [vmem:[%s1886_s15 + $0xc8] sm:$0xf0]  ;;  %v1228_v29 = vld [vmem:[%s1886_s15 + $0x20] sm:$0xf] }
  0x67   : > { %836 = vmatpush.bf16.msrb.mxu0 %v1269_v41  ;;  %600 = vmatmul.bf16.vlgmr.msra.gmra.mxu1 %v1081_v50  ;;  %v1313_v28 = vor.u32 %v1404_v25, %v1310_v27  ;;  %v1385_v30 = vld [vmem:[%s1886_s15 + $0x24] sm:$0xf0]  ;;  %v1384_v32 = vld [vmem:[%s1886_s15 + $0x24] sm:$0xf]  ;;  %v1230_v33 = vld [vmem:[%s1886_s15 + $0x28] sm:$0xf0] }
  0x68   : > { %864 = vmatpush.bf16.msrb.mxu2 %v1273_v46  ;;  %628 = vmatmul.bf16.vlgmr.msra.gmra.mxu3 %v1081_v50  ;;  %v1229_v31 = vor.u32 %v1385_v30, %v1228_v29  ;;  %v1233_v34 = vor.u32 %v1384_v32, %v1230_v33  ;;  %v1300_v35 = vld [vmem:[%s1886_s15 + $0xb0] sm:$0xf]  ;;  %v1403_v36 = vld [vmem:[%s1886_s15 + $0xb4] sm:$0xf0]  ;;  %v1402_v37 = vld [vmem:[%s1886_s15 + $0xb4] sm:$0xf] }
  0x69   : > { %614 = vmatmul.bf16.vlgmr.msra.gmra.mxu2 %v1077_v45  ;;  %850 = vmatpush.bf16.msrb.mxu1 %v1333_v53  ;;  %v1301_v38 = vor.u32 %v1403_v36, %v1300_v35  ;;  %v1302_v39 = vld [vmem:[%s1886_s15 + $0xb8] sm:$0xf0]  ;;  %v1220_v41 = vld [vmem:[%s1886_s15 + $0x10] sm:$0xf]  ;;  %v1383_v42 = vld [vmem:[%s1886_s15 + $0x14] sm:$0xf0] }
  0x6a   : > { %878 = vmatpush.bf16.msrb.mxu3 %v1337_v55  ;;  %v1305_v40 = vor.u32 %v1402_v37, %v1302_v39  ;;  %v1382_v43 = vld [vmem:[%s1886_s15 + $0x14] sm:$0xf]  ;;  %v1221_v44 = vor.u32 %v1383_v42, %v1220_v41  ;;  %v1222_v45 = vld [vmem:[%s1886_s15 + $0x18] sm:$0xf0]  ;;  %v1292_v47 = vld [vmem:[%s1886_s15 + $0xa0] sm:$0xf] }
  0x6b   : > { %837 = vmatpush.bf16.msrb.mxu0 %v1261_v54  ;;  %v1225_v46 = vor.u32 %v1382_v43, %v1222_v45  ;;  %v1401_v48 = vld [vmem:[%s1886_s15 + $0xa4] sm:$0xf0]  ;;  %v1400_v49 = vld [vmem:[%s1886_s15 + $0xa4] sm:$0xf]  ;;  %v1294_v51 = vld [vmem:[%s1886_s15 + $0xa8] sm:$0xf0] }
  0x6c   : > { %865 = vmatpush.bf16.msrb.mxu2 %v1265_v59  ;;  %v1293_v50 = vor.u32 %v1401_v48, %v1292_v47  ;;  %v1297_v52 = vor.u32 %v1400_v49, %v1294_v51  ;;  %v1212_v53 = vld [vmem:[%s1886_s15] sm:$0xf]  ;;  %v1381_v54 = vld [vmem:[%s1886_s15 + $0x4] sm:$0xf0]  ;;  %v1380_v55 = vld [vmem:[%s1886_s15 + $0x4] sm:$0xf] }
  0x6d   : > { %851 = vmatpush.bf16.msrb.mxu1 %v1325_v1  ;;  %v1213_v56 = vor.u32 %v1381_v54, %v1212_v53  ;;  %v1214_v57 = vld [vmem:[%s1886_s15 + $0x8] sm:$0xf0]  ;;  %v1284_v59 = vld [vmem:[%s1886_s15 + $0x90] sm:$0xf]  ;;  %v1399_v60 = vld [vmem:[%s1886_s15 + $0x94] sm:$0xf0] }
  0x6e   : > { %879 = vmatpush.bf16.msrb.mxu3 %v1329_v3  ;;  %v1217_v58 = vor.u32 %v1380_v55, %v1214_v57  ;;  %v1398_v61 = vld [vmem:[%s1886_s15 + $0x94] sm:$0xf]  ;;  %v1285_v62 = vor.u32 %v1399_v60, %v1284_v59  ;;  %v1286_v63 = vld [vmem:[%s1886_s15 + $0x98] sm:$0xf0]  ;;  %v1276_v1 = vld [vmem:[%s1886_s15 + $0x80] sm:$0xf] }
  0x6f   : > { %838 = vmatpush.bf16.msrb.mxu0 %v1253_v2  ;;  %v1289_v0 = vor.u32 %v1398_v61, %v1286_v63  ;;  %v1397_v2 = vld [vmem:[%s1886_s15 + $0x84] sm:$0xf0]  ;;  %v1396_v3 = vld [vmem:[%s1886_s15 + $0x84] sm:$0xf]  ;;  %v1278_v5 = vld [vmem:[%s1886_s15 + $0x88] sm:$0xf0] }
  0x70   : > { %866 = vmatpush.bf16.msrb.mxu2 %v1257_v4  ;;  %v1277_v4 = vor.u32 %v1397_v2, %v1276_v1  ;;  %v1281_v6 = vor.u32 %v1396_v3, %v1278_v5  ;;  %v402_v7 = vld [vmem:[%s1884_s30] sm:$0x3]  ;;  %v640_v42 = vld [vmem:[#allocation2 + $0x18] sm:$0xff]  ;;  %v641_v48 = vld [vmem:[#allocation2 + $0x8] sm:$0xff]  ;;  %p1338_p2 = scmp.ne.s32.totalorder %s1703_s21, 1 }
  0x71   : > { %852 = vmatpush.bf16.msrb.mxu1 %v1317_v14  ;;  %v405_v13 = vperm.slane %v402_v7, 1  ;;  %v638_v33 = vld [vmem:[#allocation2 + $0x10] sm:$0xff] }
  0x72   : > { %880 = vmatpush.bf16.msrb.mxu3 %v1321_v16 }
  0x73   : > { %839 = vmatpush.bf16.msrb.mxu0 %v1245_v9  ;;  %v404_v9 = vperm.slane %v402_v7, 0 }
  0x74   : > { %867 = vmatpush.bf16.msrb.mxu2 %v1249_v10 }
  0x75   : > { %853 = vmatpush.bf16.msrb.mxu1 %v1309_v26 }
  0x76   : > { %881 = vmatpush.bf16.msrb.mxu3 %v1313_v28 }
  0x77   : > { %840 = vmatpush.bf16.msrb.mxu0 %v1237_v20 }
  0x78   : > { %868 = vmatpush.bf16.msrb.mxu2 %v1241_v22 }
  0x79   : > { %854 = vmatpush.bf16.msrb.mxu1 %v1301_v38  ;;  %v639_v38 = vld [vmem:[#allocation2] sm:$0xff] }
  0x7a   : > { %882 = vmatpush.bf16.msrb.mxu3 %v1305_v40 }
  0x7b   : > { %841 = vmatpush.bf16.msrb.mxu0 %v1229_v31 }
  0x7c   : > { %869 = vmatpush.bf16.msrb.mxu2 %v1233_v34 }
  0x7d   : > { %855 = vmatpush.bf16.msrb.mxu1 %v1293_v50 }
  0x7e   : > { %883 = vmatpush.bf16.msrb.mxu3 %v1297_v52 }
  0x7f   : > { %842 = vmatpush.bf16.msrb.mxu0 %v1221_v44 }
  0x80   : > { %870 = vmatpush.bf16.msrb.mxu2 %v1225_v46 }
  0x81   : > { %856 = vmatpush.bf16.msrb.mxu1 %v1285_v62 }
  0x82   : > { %884 = vmatpush.bf16.msrb.mxu3 %v1289_v0 }
  0x83   : > { %843 = vmatpush.bf16.msrb.mxu0 %v1213_v56 }
  0x84   : > { %871 = vmatpush.bf16.msrb.mxu2 %v1217_v58 }
  0x85   : > { %857 = vmatpush.bf16.msrb.mxu1 %v1277_v4 }
  0x86   : > { %885 = vmatpush.bf16.msrb.mxu3 %v1281_v6 }
  0xe3   : > { %v587_v8 = vpop.f32.mrf.mxu0 }
  0xe4   : > { %v601_v10 = vpop.f32.mrf.mxu1  ;;  %v588_v11 = vadd.f32 %v587_v8, %v404_v9 }
  0xe6   : > { %v602_v16 = vadd.f32 %v601_v10, %v588_v11 }
  0xe8   : > { %v634_v21 = vmax.f32 %v602_v16, 0.0 }
  0xeb   : > { %v629_v14 = vpop.f32.mrf.mxu3  ;;  %v589_v15 = vpop.f32.mrf.mxu0 }
  0xec   : > { %v615_v12 = vpop.f32.mrf.mxu2  ;;  %v590_v17 = vadd.f32 %v589_v15, %v404_v9  ;;  %v603_v18 = vpop.f32.mrf.mxu1 }
  0xed   : > { %v616_v20 = vadd.f32 %v615_v12, %v405_v13 }
  0xee   : > { %v604_v19 = vadd.f32 %v603_v18, %v590_v17 }
  0xef   : > { %v630_v25 = vadd.f32 %v629_v14, %v616_v20 }
  0xf0   : > { %v636_v22 = vmax.f32 %v604_v19, 0.0 }
  0xf1   : > { %v635_v29 = vmax.f32 %v630_v25, 0.0 }
  0xf2   : > { %v642_v23 = vpack.c.bf16 %v636_v22, %v634_v21 }
  0xf3   : > { %v631_v27 = vpop.f32.mrf.mxu3 }
  0xf4   : > { %v617_v24 = vpop.f32.mrf.mxu2  ;;  %844 = vmatmul.bf16.vlgmr.msrb.gmra.mxu0 %v642_v23  ;;  %872 = vmatmul.bf16.vlgmr.msrb.gmra.mxu2 %v642_v23 }
  0xf5   : > { %v618_v26 = vadd.f32 %v617_v24, %v405_v13 }
  0xf7   : > { %v632_v28 = vadd.f32 %v631_v27, %v618_v26 }
  0xf9   : > { %v637_v30 = vmax.f32 %v632_v28, 0.0 }
  0xfb   : > { %v643_v31 = vpack.c.bf16 %v637_v30, %v635_v29 }
  0xfd   : > { %858 = vmatmul.bf16.vlgmr.msrb.gmra.mxu1 %v643_v31  ;;  %886 = vmatmul.bf16.vlgmr.msrb.gmra.mxu3 %v643_v31 }
 0x171   : > { %v845_v32 = vpop.f32.mrf.mxu0 }
 0x177   : > { %v873_v37 = vpop.f32.mrf.mxu2 }
 0x179   : > { %v847_v41 = vpop.f32.mrf.mxu0 }
 0x17a   : > { %v859_v34 = vpop.f32.mrf.mxu1 }
 0x17b   : > { %v860_v35 = vadd.f32 %v859_v34, %v845_v32 }
 0x17d   : > { %v892_v36 = vadd.f32 %v860_v35, %v638_v33 }
 0x17f   : > { %896 = vst [vmem:[#allocation2 + $0x10] sm:$0xff] %v892_v36  ;;  %v875_v47 = vpop.f32.mrf.mxu2 }
 0x180   : > { %v887_v39 = vpop.f32.mrf.mxu3 }
 0x181   : > { %v888_v40 = vadd.f32 %v887_v39, %v873_v37 }
 0x182   : > { %v861_v43 = vpop.f32.mrf.mxu1 }
 0x183   : > { %v893_v44 = vadd.f32 %v888_v40, %v639_v38  ;;  %v862_v45 = vadd.f32 %v861_v43, %v847_v41 }
 0x185   : > { %897 = vst [vmem:[#allocation2] sm:$0xff] %v893_v44  ;;  %v894_v46 = vadd.f32 %v862_v45, %v640_v42 }
 0x187   : > { %898 = vst [vmem:[#allocation2 + $0x18] sm:$0xff] %v894_v46 }
 0x188   : > { %v889_v49 = vpop.f32.mrf.mxu3 }
 0x189   : > { %v890_v50 = vadd.f32 %v889_v49, %v875_v47  ;;  %903 = sbr.rel (%p1338_p2) target bundleno = 410 (0x19a), region = 64 }
 0x18b   : > { %v895_v51 = vadd.f32 %v890_v50, %v641_v48 }
 0x18d   : > { %899 = vst [vmem:[#allocation2 + $0x8] sm:$0xff] %v895_v51 }
 0x18e   : > { %v904_v52 = vld [vmem:[#allocation2 + $0x10] sm:$0xff]  ;;  %v905_v53 = vld [vmem:[#allocation2] sm:$0xff]  ;;  %v906_v57 = vld [vmem:[#allocation2 + $0x18] sm:$0xff] }
 0x18f   : > { %v908_v54 = vld [vmem:[%s2052_s4] sm:$0x3] }
 0x190   : > { %v910_v55 = vperm.slane %v908_v54, 0  ;;  %v911_v56 = vperm.slane %v908_v54, 1 }
 0x192   : > { %v914_v59 = vadd.f32 %v910_v55, %v904_v52  ;;  %v915_v60 = vadd.f32 %v911_v56, %v905_v53  ;;  %v916_v61 = vadd.f32 %v910_v55, %v906_v57 }
 0x194   : > { %v907_v58 = vld [vmem:[#allocation2 + $0x8] sm:$0xff]  ;;  %v918_v63 = vpack.c.bf16 %v915_v60, %v914_v59 }
 0x195   : > { %v917_v62 = vadd.f32 %v911_v56, %v907_v58 }
 0x196   : > { %920 = vst [vmem:[#allocation11] sm:$0xff] %v918_v63 }
 0x197   : > { %v919_v0 = vpack.c.bf16 %v917_v62, %v916_v61 }
 0x199   : > { %921 = vst [vmem:[#allocation11 + $0x8] sm:$0xff] %v919_v0 }
 0x19a PF: > { %p1443_p3 = scmp.eq.s32.totalorder %s1823_s27, 1  ;;  %s933_s8 = sshll.u32 %s2053_s5, 4  ;;  %s934_s8 = int_to_ptr.hbm [resolvable:$true] %s933_s8 }
 0x19b   : > { %s1718_s9 = smov [#allocation11]   ;;  %s1719_s28 = smov 128  }
 0x19c   : > { %s931_s11 = sshll.u32 %s1718_s9, 4  ;;  %s1720_s7 = smov 8   ;;  %s932_s11 = int_to_ptr.vmem [resolvable:$true] %s931_s11 }
 0x19d   : > { %1423 = dma.vmem_to_hbm [thread:$0]  (%p1443_p3), %s932_s11, 256, %s934_s8, [#allocation5], %s1719_s28, %s1719_s28, %s1720_s7  }
 0x19e   : > { %1686 = dma.done.wait (%p1443_p3), [#allocation5], 256  }
 0x19f   : > { %1688 = vsyncadd (%p1443_p3), [#allocation5], 4294967040 }
 0x1a0 PF: > { %s23_s23 = sadd.s32 1, %s1711_s23   ;;  %s2072_s10 = sld [smem:[#allocation16_spill]] }
 0x1a1   : > { %p20_p4 = scmp.ge.s32.totalorder %s23_s23, 4   ;;  %s2073_s20 = sld [smem:[#allocation18_spill]] }
 0x1a2   : > { %s2074_s27 = sld [smem:[#allocation17_spill]]  ;;  %s2075_s18 = smov %s1695_s19 }
 0x1a3   : > { %s2077_s21 = smov %s1707_s22 }
 0x1a4   :  { %22 = sbr.rel (!%p20_p4) target bundleno = 11 (0xb), region = 116 }
 0x1a6   : > { %s2076_s19 = smov %s2072_s10 }
 0x1a8   : > { %s2078_s22 = smov %s2074_s27 }
 0x1a9   :  { %950 = vsyncpa [#allocation4], 1 }
 0x1aa   :  { %952 = vsyncpa [#allocation4 + $0x1], 1 }
 0x1ab   :  { %953 = vsyncpa [#allocation7], 1 }
 0x1ac   :  { %955 = vsyncpa [#allocation7 + $0x1], 1 }
 0x1ad   :  { %956 = vsyncpa [#allocation10], 1 }
 0x1ae   :  { %958 = vsyncpa [#allocation10 + $0x1], 1 }
 0x1af   :  { %959 = vsyncpa [#allocation5], 1 }
 0x1b0   :  { %961 = vsyncpa [#allocation5 + $0x1], 1 }

</bundles_post_ra>
